<compile_context>
chip_gen: v6e
topology: v6e:2x2x1
jax: 0.10.0
libtpu: 0.0.40
codegen_flags: <defaults>
</compile_context>

<pallas_src>
import functools

import jax
import jax.numpy as jnp
import numpy as np
from jax.experimental import pallas as pl
from jax.experimental.pallas import tpu as pltpu


# ----------------------------------------------------------------------------
# Fused Pallas kernel: full TCN stack for a single batch element.
# ----------------------------------------------------------------------------
def _make_tcn_kernel(L, PAD, ksize, configs, cmax):
    """configs: list of (cin, cout, dilation, pad, has_downsample) per layer."""
    n_layers = len(configs)

    def kernel(*refs):
        # refs = (x_ref, <per-layer weight refs>, o_ref, act_ref, tmp_ref)
        x_ref = refs[0]
        o_ref = refs[-3]
        act_ref = refs[-2]   # current block input, causally padded
        tmp_ref = refs[-1]   # h1 (output of conv1+relu), causally padded

        # Zero the causal-pad rows of both scratch buffers once per grid step.
        # Layer writes only ever touch rows [PAD:], so these rows stay zero.
        zpad = jnp.zeros((PAD, cmax), jnp.float32)
        act_ref[0:PAD, :] = zpad
        tmp_ref[0:PAD, :] = zpad

        # Stage the (un-padded) input into the activation buffer.
        cin0 = configs[0][0]
        act_ref[PAD:PAD + L, 0:cin0] = x_ref[0]

        widx = 1
        for li, (cin, cout, dil, pad, has_ds) in enumerate(configs):
            w1_ref, b1_ref, w2_ref, b2_ref = refs[widx:widx + 4]
            widx += 4
            if has_ds:
                wd_ref, bd_ref = refs[widx:widx + 2]
                widx += 2

            def conv(hp, w_ref, b_ref):
                # hp: (PAD + L, C) value whose rows [0:PAD] are zero (causal
                # left pad; chomp is implicit).  im2col over the k dilation
                # taps -> ONE MXU matmul per conv.
                slabs = [
                    hp[PAD - pad + j * dil: PAD - pad + j * dil + L, :]
                    for j in range(ksize)
                ]
                mat = slabs[0] if ksize == 1 else jnp.concatenate(slabs, axis=-1)
                return (
                    jnp.dot(mat, w_ref[...], preferred_element_type=jnp.float32)
                    + b_ref[...]
                )

            xin = act_ref[:, 0:cin]                       # (PAD + L, cin)

            # --- conv1 + chomp + relu ---
            h1 = jnp.maximum(conv(xin, w1_ref, b1_ref), 0.0)
            # TODO(synk): nn.Dropout(0.2) after relu1/relu2 is eval-mode identity here.

            # --- conv2 + chomp + relu ---  h1 goes through the pre-zeroed tmp
            # buffer, so the causal pad costs no concatenate / extra copy.
            tmp_ref[PAD:PAD + L, 0:cout] = h1
            h2 = jnp.maximum(conv(tmp_ref[:, 0:cout], w2_ref, b2_ref), 0.0)

            # --- residual branch (optional 1x1 downsample) + final relu ---
            x_valid = xin[PAD:PAD + L, :]
            if has_ds:
                res = (
                    jnp.dot(x_valid, wd_ref[...], preferred_element_type=jnp.float32)
                    + bd_ref[...]
                )
            else:
                res = x_valid
            out = jnp.maximum(h2 + res, 0.0)              # (L, cout)

            if li == n_layers - 1:
                o_ref[0] = out
            else:
                act_ref[PAD:PAD + L, 0:cout] = out        # feed next block

    return kernel


def _const_index_map(ndim):
    return lambda b: (0,) * ndim


def temporal_conv_net(x_ncl, all_params, ksize):
    """Full TCN.  x_ncl: (B, num_inputs, L) -> (B, num_channels[-1], L)."""
    h = jnp.transpose(x_ncl, (0, 2, 1)).astype(jnp.float32)   # NCL -> (B, L, C)
    B, L, cin0 = h.shape

    configs = []
    args = [h]
    in_specs = [pl.BlockSpec((1, L, cin0), lambda b: (b, 0, 0))]

    cin = cin0
    for i, (w1, b1, w2, b2, wd, bd) in enumerate(all_params):
        cout = w1.shape[2]
        dil = 2 ** i
        pad = (ksize - 1) * dil
        has_ds = wd is not None
        configs.append((cin, cout, dil, pad, has_ds))

        layer_args = [
            w1.reshape(ksize * cin, cout),     # im2col weight layout (tap-major)
            b1,
            w2.reshape(ksize * cout, cout),
            b2,
        ]
        if has_ds:
            layer_args += [wd, bd]             # identity blocks: nothing DMA'd
        for a in layer_args:
            args.append(a)
            in_specs.append(pl.BlockSpec(a.shape, _const_index_map(a.ndim)))
        cin = cout

    cout_last = configs[-1][1]
    cmax = max([cin0] + [c[1] for c in configs])
    max_pad = max(c[3] for c in configs)
    PAD = max(8, ((max_pad + 7) // 8) * 8)     # 8-aligned causal-pad region

    kernel = _make_tcn_kernel(L, PAD, ksize, configs, cmax)

    out = pl.pallas_call(
        kernel,
        out_shape=jax.ShapeDtypeStruct((B, L, cout_last), jnp.float32),
        grid=(B,),
        in_specs=in_specs,
        # NOTE: output last dim (C=16) < 128 -> masked stores; padding channels
        # to 128 is not worth 8x HBM bytes at these tiny shapes.
        out_specs=pl.BlockSpec((1, L, cout_last), lambda b: (b, 0, 0)),
        scratch_shapes=[
            pltpu.VMEM((PAD + L, cmax), jnp.float32),   # block input (padded)
            pltpu.VMEM((PAD + L, cmax), jnp.float32),   # h1 (padded)
        ],
        compiler_params=pltpu.CompilerParams(
            dimension_semantics=("parallel",),   # >=2 grid steps -> both v7x TCs
        ),
    )(*args)

    return jnp.transpose(out, (0, 2, 1))        # back to NCL


# ----------------------------------------------------------------------------
# Deterministic parameter construction (effective weight-normed weights).
# ----------------------------------------------------------------------------
def init_tcn_params(key, num_inputs, num_channels, ksize):
    all_params = []
    cin = num_inputs
    for cout in num_channels:
        key, k1, k2, k3, k4, k5, k6 = jax.random.split(key, 7)
        # conv weights stored as (k, Cin, Cout)  (PyTorch is (Cout, Cin, k))
        w1 = 0.05 * jax.random.normal(k1, (ksize, cin, cout), jnp.float32)
        b1 = 0.05 * jax.random.normal(k2, (1, cout), jnp.float32)
        w2 = 0.05 * jax.random.normal(k3, (ksize, cout, cout), jnp.float32)
        b2 = 0.05 * jax.random.normal(k4, (1, cout), jnp.float32)
        if cin != cout:
            wd = 0.05 * jax.random.normal(k5, (cin, cout), jnp.float32)
            bd = 0.05 * jax.random.normal(k6, (1, cout), jnp.float32)
        else:                                     # identity residual
            wd, bd = None, None
        all_params.append((w1, b1, w2, b2, wd, bd))
        cin = cout
    return all_params


# ----------------------------------------------------------------------------
# Pure-JAX reference (same math as the PyTorch module, eval mode).
# ----------------------------------------------------------------------------
def _causal_conv_ref(x_blc, w, b, dilation):
    k = w.shape[0]
    pad = (k - 1) * dilation
    L = x_blc.shape[1]
    xp = jnp.pad(x_blc, ((0, 0), (pad, 0), (0, 0)))
    out = b[None, :, :]
    for j in range(k):
        out = out + jnp.einsum(
            "blc,cd->bld", xp[:, j * dilation: j * dilation + L, :], w[j]
        )
    return out


def tcn_reference(x_ncl, all_params, ksize):
    h = jnp.transpose(x_ncl, (0, 2, 1)).astype(jnp.float32)
    for i, (w1, b1, w2, b2, wd, bd) in enumerate(all_params):
        dilation = 2 ** i
        out = jax.nn.relu(_causal_conv_ref(h, w1, b1, dilation))
        out = jax.nn.relu(_causal_conv_ref(out, w2, b2, dilation))
        if wd is not None:                      # cin != cout -> 1x1 downsample
            res = jnp.einsum("blc,cd->bld", h, wd) + bd[None, :, :]
        else:
            res = h
        h = jax.nn.relu(out + res)
    return jnp.transpose(h, (0, 2, 1))


# ----------------------------------------------------------------------------
if __name__ == "__main__":
    key = jax.random.PRNGKey(0)

    B, num_inputs, L = 2, 8, 32
    num_channels = (16, 16, 16)   # dilations 1, 2, 4 ; first block has downsample
    kernel_size = 2

    key, pkey, xkey = jax.random.split(key, 3)
    params = init_tcn_params(pkey, num_inputs, num_channels, kernel_size)
    x = jax.random.normal(xkey, (B, num_inputs, L), jnp.float32)  # NCL like PyTorch

    tcn = jax.jit(functools.partial(temporal_conv_net, ksize=kernel_size))
    y = jax.block_until_ready(tcn(x, params))

    y_ref = tcn_reference(x, params, kernel_size)
    assert y.shape == (B, num_channels[-1], L), y.shape
    assert np.allclose(np.asarray(y), np.asarray(y_ref), atol=1e-4, rtol=1e-4)

    print("KERNEL_OK")
</pallas_src>

<mosaic_0001>
module attributes {stable_mosaic.version = 11 : i64} {
  func.func @kernel(%arg0: i32, %arg1: memref<1x32x8xf32, #tpu.memory_space<vmem>>, %arg2: memref<16x16xf32, #tpu.memory_space<vmem>>, %arg3: memref<1x16xf32, #tpu.memory_space<vmem>>, %arg4: memref<32x16xf32, #tpu.memory_space<vmem>>, %arg5: memref<1x16xf32, #tpu.memory_space<vmem>>, %arg6: memref<8x16xf32, #tpu.memory_space<vmem>>, %arg7: memref<1x16xf32, #tpu.memory_space<vmem>>, %arg8: memref<32x16xf32, #tpu.memory_space<vmem>>, %arg9: memref<1x16xf32, #tpu.memory_space<vmem>>, %arg10: memref<32x16xf32, #tpu.memory_space<vmem>>, %arg11: memref<1x16xf32, #tpu.memory_space<vmem>>, %arg12: memref<32x16xf32, #tpu.memory_space<vmem>>, %arg13: memref<1x16xf32, #tpu.memory_space<vmem>>, %arg14: memref<32x16xf32, #tpu.memory_space<vmem>>, %arg15: memref<1x16xf32, #tpu.memory_space<vmem>>, %arg16: memref<1x32x16xf32, #tpu.memory_space<vmem>>, %arg17: memref<40x16xf32, #tpu.memory_space<vmem>>, %arg18: memref<40x16xf32, #tpu.memory_space<vmem>>) attributes {dimension_semantics = [#tpu.dimension_semantics<parallel>], iteration_bounds = array<i64: 2>, scalar_prefetch = 0 : i64, scratch_operands = 2 : i64, tpu.core_type = #tpu.core_type<tc>, window_params = [{transform_indices = @transform_0, window_bounds = array<i64: 1, 32, 8>}, {pipeline_mode = #tpu.pipeline_mode<synchronous>, transform_indices = @transform_1, window_bounds = array<i64: 16, 16>}, {pipeline_mode = #tpu.pipeline_mode<synchronous>, transform_indices = @transform_2, window_bounds = array<i64: 1, 16>}, {pipeline_mode = #tpu.pipeline_mode<synchronous>, transform_indices = @transform_3, window_bounds = array<i64: 32, 16>}, {pipeline_mode = #tpu.pipeline_mode<synchronous>, transform_indices = @transform_4, window_bounds = array<i64: 1, 16>}, {pipeline_mode = #tpu.pipeline_mode<synchronous>, transform_indices = @transform_5, window_bounds = array<i64: 8, 16>}, {pipeline_mode = #tpu.pipeline_mode<synchronous>, transform_indices = @transform_6, window_bounds = array<i64: 1, 16>}, {pipeline_mode = #tpu.pipeline_mode<synchronous>, transform_indices = @transform_7, window_bounds = array<i64: 32, 16>}, {pipeline_mode = #tpu.pipeline_mode<synchronous>, transform_indices = @transform_8, window_bounds = array<i64: 1, 16>}, {pipeline_mode = #tpu.pipeline_mode<synchronous>, transform_indices = @transform_9, window_bounds = array<i64: 32, 16>}, {pipeline_mode = #tpu.pipeline_mode<synchronous>, transform_indices = @transform_10, window_bounds = array<i64: 1, 16>}, {pipeline_mode = #tpu.pipeline_mode<synchronous>, transform_indices = @transform_11, window_bounds = array<i64: 32, 16>}, {pipeline_mode = #tpu.pipeline_mode<synchronous>, transform_indices = @transform_12, window_bounds = array<i64: 1, 16>}, {pipeline_mode = #tpu.pipeline_mode<synchronous>, transform_indices = @transform_13, window_bounds = array<i64: 32, 16>}, {pipeline_mode = #tpu.pipeline_mode<synchronous>, transform_indices = @transform_14, window_bounds = array<i64: 1, 16>}, {transform_indices = @transform_15, window_bounds = array<i64: 1, 32, 16>}]} {
    %cst = arith.constant 0.000000e+00 : f32
    %0 = vector.broadcast %cst : f32 to vector<8x16xf32>
    %c0 = arith.constant 0 : index
    %c0_0 = arith.constant 0 : index
    %1 = vector.load %arg17[%c0, %c0_0] : memref<40x16xf32, #tpu.memory_space<vmem>>, vector<8x16xf32>
    tpu.vector_store %arg17[%c0, %c0_0], %0 {strides = array<i32>} : memref<40x16xf32, #tpu.memory_space<vmem>>, vector<8x16xf32>,
    %c0_1 = arith.constant 0 : index
    %c0_2 = arith.constant 0 : index
    %2 = vector.load %arg18[%c0_1, %c0_2] : memref<40x16xf32, #tpu.memory_space<vmem>>, vector<8x16xf32>
    tpu.vector_store %arg18[%c0_1, %c0_2], %0 {strides = array<i32>} : memref<40x16xf32, #tpu.memory_space<vmem>>, vector<8x16xf32>,
    %c0_3 = arith.constant 0 : index
    %c0_4 = arith.constant 0 : index
    %c0_5 = arith.constant 0 : index
    %3 = vector.load %arg1[%c0_3, %c0_4, %c0_5] : memref<1x32x8xf32, #tpu.memory_space<vmem>>, vector<1x32x8xf32>
    %4 = vector.shape_cast %3 : vector<1x32x8xf32> to vector<32x8xf32>
    %c8 = arith.constant 8 : index
    %c0_6 = arith.constant 0 : index
    %5 = vector.load %arg17[%c8, %c0_6] : memref<40x16xf32, #tpu.memory_space<vmem>>, vector<32x8xf32>
    tpu.vector_store %arg17[%c8, %c0_6], %4 {strides = array<i32>} : memref<40x16xf32, #tpu.memory_space<vmem>>, vector<32x8xf32>,
    %c0_7 = arith.constant 0 : index
    %c0_8 = arith.constant 0 : index
    %6 = vector.load %arg17[%c0_7, %c0_8] : memref<40x16xf32, #tpu.memory_space<vmem>>, vector<40x8xf32>
    %7 = vector.extract_strided_slice %6 {offsets = [7, 0], sizes = [32, 8], strides = [1, 1]} : vector<40x8xf32> to vector<32x8xf32>
    %8 = vector.extract_strided_slice %6 {offsets = [8, 0], sizes = [32, 8], strides = [1, 1]} : vector<40x8xf32> to vector<32x8xf32>
    %9 = tpu.concatenate %7, %8 in 1 : vector<32x8xf32>, vector<32x8xf32> -> vector<32x16xf32>
    %c0_9 = arith.constant 0 : index
    %c0_10 = arith.constant 0 : index
    %10 = vector.load %arg2[%c0_9, %c0_10] : memref<16x16xf32, #tpu.memory_space<vmem>>, vector<16x16xf32>
    %cst_11 = arith.constant dense<0.000000e+00> : vector<32x16xf32>
    %11 = tpu.matmul %9, %10, %cst_11 {dimension_numbers = #tpu.dot_dimension_numbers<[1], [0], [0], [1], [0, 0, 1, 1], [], []>} : vector<32x16xf32>, vector<16x16xf32>, vector<32x16xf32> -> vector<32x16xf32>
    %c0_12 = arith.constant 0 : index
    %c0_13 = arith.constant 0 : index
    %12 = vector.load %arg3[%c0_12, %c0_13] : memref<1x16xf32, #tpu.memory_space<vmem>>, vector<1x16xf32>
    %13 = vector.broadcast %12 : vector<1x16xf32> to vector<32x16xf32>
    %14 = arith.addf %11, %13 : vector<32x16xf32>
    %cst_14 = arith.constant 0.000000e+00 : f32
    %15 = vector.broadcast %cst_14 : f32 to vector<32x16xf32>
    %16 = arith.maximumf %14, %15 : vector<32x16xf32>
    %c8_15 = arith.constant 8 : index
    %c0_16 = arith.constant 0 : index
    %17 = vector.load %arg18[%c8_15, %c0_16] : memref<40x16xf32, #tpu.memory_space<vmem>>, vector<32x16xf32>
    tpu.vector_store %arg18[%c8_15, %c0_16], %16 {strides = array<i32>} : memref<40x16xf32, #tpu.memory_space<vmem>>, vector<32x16xf32>,
    %c0_17 = arith.constant 0 : index
    %c0_18 = arith.constant 0 : index
    %18 = vector.load %arg18[%c0_17, %c0_18] : memref<40x16xf32, #tpu.memory_space<vmem>>, vector<40x16xf32>
    %19 = vector.extract_strided_slice %18 {offsets = [7, 0], sizes = [32, 16], strides = [1, 1]} : vector<40x16xf32> to vector<32x16xf32>
    %20 = vector.extract_strided_slice %18 {offsets = [8, 0], sizes = [32, 16], strides = [1, 1]} : vector<40x16xf32> to vector<32x16xf32>
    %21 = tpu.concatenate %19, %20 in 1 : vector<32x16xf32>, vector<32x16xf32> -> vector<32x32xf32>
    %c0_19 = arith.constant 0 : index
    %c0_20 = arith.constant 0 : index
    %22 = vector.load %arg4[%c0_19, %c0_20] : memref<32x16xf32, #tpu.memory_space<vmem>>, vector<32x16xf32>
    %cst_21 = arith.constant dense<0.000000e+00> : vector<32x16xf32>
    %23 = tpu.matmul %21, %22, %cst_21 {dimension_numbers = #tpu.dot_dimension_numbers<[1], [0], [0], [1], [0, 0, 1, 1], [], []>} : vector<32x32xf32>, vector<32x16xf32>, vector<32x16xf32> -> vector<32x16xf32>
    %c0_22 = arith.constant 0 : index
    %c0_23 = arith.constant 0 : index
    %24 = vector.load %arg5[%c0_22, %c0_23] : memref<1x16xf32, #tpu.memory_space<vmem>>, vector<1x16xf32>
    %25 = vector.broadcast %24 : vector<1x16xf32> to vector<32x16xf32>
    %26 = arith.addf %23, %25 : vector<32x16xf32>
    %cst_24 = arith.constant 0.000000e+00 : f32
    %27 = vector.broadcast %cst_24 : f32 to vector<32x16xf32>
    %28 = arith.maximumf %26, %27 : vector<32x16xf32>
    %29 = vector.extract_strided_slice %6 {offsets = [8, 0], sizes = [32, 8], strides = [1, 1]} : vector<40x8xf32> to vector<32x8xf32>
    %c0_25 = arith.constant 0 : index
    %c0_26 = arith.constant 0 : index
    %30 = vector.load %arg6[%c0_25, %c0_26] : memref<8x16xf32, #tpu.memory_space<vmem>>, vector<8x16xf32>
    %cst_27 = arith.constant dense<0.000000e+00> : vector<32x16xf32>
    %31 = tpu.matmul %29, %30, %cst_27 {dimension_numbers = #tpu.dot_dimension_numbers<[1], [0], [0], [1], [0, 0, 1, 1], [], []>} : vector<32x8xf32>, vector<8x16xf32>, vector<32x16xf32> -> vector<32x16xf32>
    %c0_28 = arith.constant 0 : index
    %c0_29 = arith.constant 0 : index
    %32 = vector.load %arg7[%c0_28, %c0_29] : memref<1x16xf32, #tpu.memory_space<vmem>>, vector<1x16xf32>
    %33 = vector.broadcast %32 : vector<1x16xf32> to vector<32x16xf32>
    %34 = arith.addf %31, %33 : vector<32x16xf32>
    %35 = arith.addf %28, %34 : vector<32x16xf32>
    %cst_30 = arith.constant 0.000000e+00 : f32
    %36 = vector.broadcast %cst_30 : f32 to vector<32x16xf32>
    %37 = arith.maximumf %35, %36 : vector<32x16xf32>
    %c8_31 = arith.constant 8 : index
    %c0_32 = arith.constant 0 : index
    %38 = vector.load %arg17[%c8_31, %c0_32] : memref<40x16xf32, #tpu.memory_space<vmem>>, vector<32x16xf32>
    tpu.vector_store %arg17[%c8_31, %c0_32], %37 {strides = array<i32>} : memref<40x16xf32, #tpu.memory_space<vmem>>, vector<32x16xf32>,
    %c0_33 = arith.constant 0 : index
    %c0_34 = arith.constant 0 : index
    %39 = vector.load %arg17[%c0_33, %c0_34] : memref<40x16xf32, #tpu.memory_space<vmem>>, vector<40x16xf32>
    %40 = vector.extract_strided_slice %39 {offsets = [6, 0], sizes = [32, 16], strides = [1, 1]} : vector<40x16xf32> to vector<32x16xf32>
    %41 = vector.extract_strided_slice %39 {offsets = [8, 0], sizes = [32, 16], strides = [1, 1]} : vector<40x16xf32> to vector<32x16xf32>
    %42 = tpu.concatenate %40, %41 in 1 : vector<32x16xf32>, vector<32x16xf32> -> vector<32x32xf32>
    %c0_35 = arith.constant 0 : index
    %c0_36 = arith.constant 0 : index
    %43 = vector.load %arg8[%c0_35, %c0_36] : memref<32x16xf32, #tpu.memory_space<vmem>>, vector<32x16xf32>
    %cst_37 = arith.constant dense<0.000000e+00> : vector<32x16xf32>
    %44 = tpu.matmul %42, %43, %cst_37 {dimension_numbers = #tpu.dot_dimension_numbers<[1], [0], [0], [1], [0, 0, 1, 1], [], []>} : vector<32x32xf32>, vector<32x16xf32>, vector<32x16xf32> -> vector<32x16xf32>
    %c0_38 = arith.constant 0 : index
    %c0_39 = arith.constant 0 : index
    %45 = vector.load %arg9[%c0_38, %c0_39] : memref<1x16xf32, #tpu.memory_space<vmem>>, vector<1x16xf32>
    %46 = vector.broadcast %45 : vector<1x16xf32> to vector<32x16xf32>
    %47 = arith.addf %44, %46 : vector<32x16xf32>
    %cst_40 = arith.constant 0.000000e+00 : f32
    %48 = vector.broadcast %cst_40 : f32 to vector<32x16xf32>
    %49 = arith.maximumf %47, %48 : vector<32x16xf32>
    %c8_41 = arith.constant 8 : index
    %c0_42 = arith.constant 0 : index
    %50 = vector.load %arg18[%c8_41, %c0_42] : memref<40x16xf32, #tpu.memory_space<vmem>>, vector<32x16xf32>
    tpu.vector_store %arg18[%c8_41, %c0_42], %49 {strides = array<i32>} : memref<40x16xf32, #tpu.memory_space<vmem>>, vector<32x16xf32>,
    %c0_43 = arith.constant 0 : index
    %c0_44 = arith.constant 0 : index
    %51 = vector.load %arg18[%c0_43, %c0_44] : memref<40x16xf32, #tpu.memory_space<vmem>>, vector<40x16xf32>
    %52 = vector.extract_strided_slice %51 {offsets = [6, 0], sizes = [32, 16], strides = [1, 1]} : vector<40x16xf32> to vector<32x16xf32>
    %53 = vector.extract_strided_slice %51 {offsets = [8, 0], sizes = [32, 16], strides = [1, 1]} : vector<40x16xf32> to vector<32x16xf32>
    %54 = tpu.concatenate %52, %53 in 1 : vector<32x16xf32>, vector<32x16xf32> -> vector<32x32xf32>
    %c0_45 = arith.constant 0 : index
    %c0_46 = arith.constant 0 : index
    %55 = vector.load %arg10[%c0_45, %c0_46] : memref<32x16xf32, #tpu.memory_space<vmem>>, vector<32x16xf32>
    %cst_47 = arith.constant dense<0.000000e+00> : vector<32x16xf32>
    %56 = tpu.matmul %54, %55, %cst_47 {dimension_numbers = #tpu.dot_dimension_numbers<[1], [0], [0], [1], [0, 0, 1, 1], [], []>} : vector<32x32xf32>, vector<32x16xf32>, vector<32x16xf32> -> vector<32x16xf32>
    %c0_48 = arith.constant 0 : index
    %c0_49 = arith.constant 0 : index
    %57 = vector.load %arg11[%c0_48, %c0_49] : memref<1x16xf32, #tpu.memory_space<vmem>>, vector<1x16xf32>
    %58 = vector.broadcast %57 : vector<1x16xf32> to vector<32x16xf32>
    %59 = arith.addf %56, %58 : vector<32x16xf32>
    %cst_50 = arith.constant 0.000000e+00 : f32
    %60 = vector.broadcast %cst_50 : f32 to vector<32x16xf32>
    %61 = arith.maximumf %59, %60 : vector<32x16xf32>
    %62 = vector.extract_strided_slice %39 {offsets = [8, 0], sizes = [32, 16], strides = [1, 1]} : vector<40x16xf32> to vector<32x16xf32>
    %63 = arith.addf %61, %62 : vector<32x16xf32>
    %cst_51 = arith.constant 0.000000e+00 : f32
    %64 = vector.broadcast %cst_51 : f32 to vector<32x16xf32>
    %65 = arith.maximumf %63, %64 : vector<32x16xf32>
    %c8_52 = arith.constant 8 : index
    %c0_53 = arith.constant 0 : index
    %66 = vector.load %arg17[%c8_52, %c0_53] : memref<40x16xf32, #tpu.memory_space<vmem>>, vector<32x16xf32>
    tpu.vector_store %arg17[%c8_52, %c0_53], %65 {strides = array<i32>} : memref<40x16xf32, #tpu.memory_space<vmem>>, vector<32x16xf32>,
    %c0_54 = arith.constant 0 : index
    %c0_55 = arith.constant 0 : index
    %67 = vector.load %arg17[%c0_54, %c0_55] : memref<40x16xf32, #tpu.memory_space<vmem>>, vector<40x16xf32>
    %68 = vector.extract_strided_slice %67 {offsets = [4, 0], sizes = [32, 16], strides = [1, 1]} : vector<40x16xf32> to vector<32x16xf32>
    %69 = vector.extract_strided_slice %67 {offsets = [8, 0], sizes = [32, 16], strides = [1, 1]} : vector<40x16xf32> to vector<32x16xf32>
    %70 = tpu.concatenate %68, %69 in 1 : vector<32x16xf32>, vector<32x16xf32> -> vector<32x32xf32>
    %c0_56 = arith.constant 0 : index
    %c0_57 = arith.constant 0 : index
    %71 = vector.load %arg12[%c0_56, %c0_57] : memref<32x16xf32, #tpu.memory_space<vmem>>, vector<32x16xf32>
    %cst_58 = arith.constant dense<0.000000e+00> : vector<32x16xf32>
    %72 = tpu.matmul %70, %71, %cst_58 {dimension_numbers = #tpu.dot_dimension_numbers<[1], [0], [0], [1], [0, 0, 1, 1], [], []>} : vector<32x32xf32>, vector<32x16xf32>, vector<32x16xf32> -> vector<32x16xf32>
    %c0_59 = arith.constant 0 : index
    %c0_60 = arith.constant 0 : index
    %73 = vector.load %arg13[%c0_59, %c0_60] : memref<1x16xf32, #tpu.memory_space<vmem>>, vector<1x16xf32>
    %74 = vector.broadcast %73 : vector<1x16xf32> to vector<32x16xf32>
    %75 = arith.addf %72, %74 : vector<32x16xf32>
    %cst_61 = arith.constant 0.000000e+00 : f32
    %76 = vector.broadcast %cst_61 : f32 to vector<32x16xf32>
    %77 = arith.maximumf %75, %76 : vector<32x16xf32>
    %c8_62 = arith.constant 8 : index
    %c0_63 = arith.constant 0 : index
    %78 = vector.load %arg18[%c8_62, %c0_63] : memref<40x16xf32, #tpu.memory_space<vmem>>, vector<32x16xf32>
    tpu.vector_store %arg18[%c8_62, %c0_63], %77 {strides = array<i32>} : memref<40x16xf32, #tpu.memory_space<vmem>>, vector<32x16xf32>,
    %c0_64 = arith.constant 0 : index
    %c0_65 = arith.constant 0 : index
    %79 = vector.load %arg18[%c0_64, %c0_65] : memref<40x16xf32, #tpu.memory_space<vmem>>, vector<40x16xf32>
    %80 = vector.extract_strided_slice %79 {offsets = [4, 0], sizes = [32, 16], strides = [1, 1]} : vector<40x16xf32> to vector<32x16xf32>
    %81 = vector.extract_strided_slice %79 {offsets = [8, 0], sizes = [32, 16], strides = [1, 1]} : vector<40x16xf32> to vector<32x16xf32>
    %82 = tpu.concatenate %80, %81 in 1 : vector<32x16xf32>, vector<32x16xf32> -> vector<32x32xf32>
    %c0_66 = arith.constant 0 : index
    %c0_67 = arith.constant 0 : index
    %83 = vector.load %arg14[%c0_66, %c0_67] : memref<32x16xf32, #tpu.memory_space<vmem>>, vector<32x16xf32>
    %cst_68 = arith.constant dense<0.000000e+00> : vector<32x16xf32>
    %84 = tpu.matmul %82, %83, %cst_68 {dimension_numbers = #tpu.dot_dimension_numbers<[1], [0], [0], [1], [0, 0, 1, 1], [], []>} : vector<32x32xf32>, vector<32x16xf32>, vector<32x16xf32> -> vector<32x16xf32>
    %c0_69 = arith.constant 0 : index
    %c0_70 = arith.constant 0 : index
    %85 = vector.load %arg15[%c0_69, %c0_70] : memref<1x16xf32, #tpu.memory_space<vmem>>, vector<1x16xf32>
    %86 = vector.broadcast %85 : vector<1x16xf32> to vector<32x16xf32>
    %87 = arith.addf %84, %86 : vector<32x16xf32>
    %cst_71 = arith.constant 0.000000e+00 : f32
    %88 = vector.broadcast %cst_71 : f32 to vector<32x16xf32>
    %89 = arith.maximumf %87, %88 : vector<32x16xf32>
    %90 = vector.extract_strided_slice %67 {offsets = [8, 0], sizes = [32, 16], strides = [1, 1]} : vector<40x16xf32> to vector<32x16xf32>
    %91 = arith.addf %89, %90 : vector<32x16xf32>
    %cst_72 = arith.constant 0.000000e+00 : f32
    %92 = vector.broadcast %cst_72 : f32 to vector<32x16xf32>
    %93 = arith.maximumf %91, %92 : vector<32x16xf32>
    %c0_73 = arith.constant 0 : index
    %c0_74 = arith.constant 0 : index
    %c0_75 = arith.constant 0 : index
    %94 = vector.load %arg16[%c0_73, %c0_74, %c0_75] : memref<1x32x16xf32, #tpu.memory_space<vmem>>, vector<1x32x16xf32>
    %95 = vector.shape_cast %94 : vector<1x32x16xf32> to vector<32x16xf32>
    %96 = vector.shape_cast %93 : vector<32x16xf32> to vector<1x32x16xf32>
    tpu.vector_store %arg16[%c0_73, %c0_74, %c0_75], %96 {strides = array<i32>} : memref<1x32x16xf32, #tpu.memory_space<vmem>>, vector<1x32x16xf32>,
    return
  }
  func.func @transform_0(%arg0: i32) -> (i32, i32, i32) {
    %c0_i32 = arith.constant 0 : i32
    %c0_i32_0 = arith.constant 0 : i32
    %c0_i32_1 = arith.constant 0 : i32
    return %arg0, %c0_i32, %c0_i32_0 : i32, i32, i32
  }
  func.func @transform_1(%arg0: i32) -> (i32, i32) {
    %c0_i32 = arith.constant 0 : i32
    %c0_i32_0 = arith.constant 0 : i32
    %c0_i32_1 = arith.constant 0 : i32
    return %c0_i32, %c0_i32_0 : i32, i32
  }
  func.func @transform_2(%arg0: i32) -> (i32, i32) {
    %c0_i32 = arith.constant 0 : i32
    %c0_i32_0 = arith.constant 0 : i32
    %c0_i32_1 = arith.constant 0 : i32
    return %c0_i32, %c0_i32_0 : i32, i32
  }
  func.func @transform_3(%arg0: i32) -> (i32, i32) {
    %c0_i32 = arith.constant 0 : i32
    %c0_i32_0 = arith.constant 0 : i32
    %c0_i32_1 = arith.constant 0 : i32
    return %c0_i32, %c0_i32_0 : i32, i32
  }
  func.func @transform_4(%arg0: i32) -> (i32, i32) {
    %c0_i32 = arith.constant 0 : i32
    %c0_i32_0 = arith.constant 0 : i32
    %c0_i32_1 = arith.constant 0 : i32
    return %c0_i32, %c0_i32_0 : i32, i32
  }
  func.func @transform_5(%arg0: i32) -> (i32, i32) {
    %c0_i32 = arith.constant 0 : i32
    %c0_i32_0 = arith.constant 0 : i32
    %c0_i32_1 = arith.constant 0 : i32
    return %c0_i32, %c0_i32_0 : i32, i32
  }
  func.func @transform_6(%arg0: i32) -> (i32, i32) {
    %c0_i32 = arith.constant 0 : i32
    %c0_i32_0 = arith.constant 0 : i32
    %c0_i32_1 = arith.constant 0 : i32
    return %c0_i32, %c0_i32_0 : i32, i32
  }
  func.func @transform_7(%arg0: i32) -> (i32, i32) {
    %c0_i32 = arith.constant 0 : i32
    %c0_i32_0 = arith.constant 0 : i32
    %c0_i32_1 = arith.constant 0 : i32
    return %c0_i32, %c0_i32_0 : i32, i32
  }
  func.func @transform_8(%arg0: i32) -> (i32, i32) {
    %c0_i32 = arith.constant 0 : i32
    %c0_i32_0 = arith.constant 0 : i32
    %c0_i32_1 = arith.constant 0 : i32
    return %c0_i32, %c0_i32_0 : i32, i32
  }
  func.func @transform_9(%arg0: i32) -> (i32, i32) {
    %c0_i32 = arith.constant 0 : i32
    %c0_i32_0 = arith.constant 0 : i32
    %c0_i32_1 = arith.constant 0 : i32
    return %c0_i32, %c0_i32_0 : i32, i32
  }
  func.func @transform_10(%arg0: i32) -> (i32, i32) {
    %c0_i32 = arith.constant 0 : i32
    %c0_i32_0 = arith.constant 0 : i32
    %c0_i32_1 = arith.constant 0 : i32
    return %c0_i32, %c0_i32_0 : i32, i32
  }
  func.func @transform_11(%arg0: i32) -> (i32, i32) {
    %c0_i32 = arith.constant 0 : i32
    %c0_i32_0 = arith.constant 0 : i32
    %c0_i32_1 = arith.constant 0 : i32
    return %c0_i32, %c0_i32_0 : i32, i32
  }
  func.func @transform_12(%arg0: i32) -> (i32, i32) {
    %c0_i32 = arith.constant 0 : i32
    %c0_i32_0 = arith.constant 0 : i32
    %c0_i32_1 = arith.constant 0 : i32
    return %c0_i32, %c0_i32_0 : i32, i32
  }
  func.func @transform_13(%arg0: i32) -> (i32, i32) {
    %c0_i32 = arith.constant 0 : i32
    %c0_i32_0 = arith.constant 0 : i32
    %c0_i32_1 = arith.constant 0 : i32
    return %c0_i32, %c0_i32_0 : i32, i32
  }
  func.func @transform_14(%arg0: i32) -> (i32, i32) {
    %c0_i32 = arith.constant 0 : i32
    %c0_i32_0 = arith.constant 0 : i32
    %c0_i32_1 = arith.constant 0 : i32
    return %c0_i32, %c0_i32_0 : i32, i32
  }
  func.func @transform_15(%arg0: i32) -> (i32, i32, i32) {
    %c0_i32 = arith.constant 0 : i32
    %c0_i32_0 = arith.constant 0 : i32
    %c0_i32_1 = arith.constant 0 : i32
    return %arg0, %c0_i32, %c0_i32_0 : i32, i32, i32
  }
}

</mosaic_0001>

<bundles_post_ra>
// kernel: temporal_conv_net.1
= control target key start
LH: loop header
LB: loop body
LE: loop exit
PB: predicated region body
PF: predicated region fallthrough
CT: control target
= control target key end

     0   :  { %20 = vsyncpa [#allocation5], 0  ;;  %s2679_s0 = inlined_call_operand.vmem [shape: f32[2,32,8], index: 0, kind: input, shape index: {}]   ;;  %s2680_s1 = inlined_call_operand.hbm [shape: f32[16,16], index: 1, kind: input, shape index: {}]   ;;  %s2681_s2 = inlined_call_operand.hbm [shape: f32[1,16], index: 2, kind: input, shape index: {}]   ;;  %s2682_s3 = inlined_call_operand.vmem [shape: f32[32,16], index: 3, kind: input, shape index: {}]   ;;  %s2683_s4 = inlined_call_operand.vmem [shape: f32[1,16], index: 4, kind: input, shape index: {}]   ;;  %s2684_s5 = inlined_call_operand.hbm [shape: f32[8,16], index: 5, kind: input, shape index: {}]   ;;  %s2685_s6 = inlined_call_operand.vmem [shape: f32[1,16], index: 6, kind: input, shape index: {}]   ;;  %s2686_s7 = inlined_call_operand.vmem [shape: f32[32,16], index: 7, kind: input, shape index: {}]   ;;  %s2687_s8 = inlined_call_operand.vmem [shape: f32[1,16], index: 8, kind: input, shape index: {}]   ;;  %s2688_s9 = inlined_call_operand.vmem [shape: f32[32,16], index: 9, kind: input, shape index: {}]   ;;  %s2689_s10 = inlined_call_operand.vmem [shape: f32[1,16], index: 10, kind: input, shape index: {}]   ;;  %s2690_s11 = inlined_call_operand.hbm [shape: f32[32,16], index: 11, kind: input, shape index: {}]   ;;  %s2691_s12 = inlined_call_operand.vmem [shape: f32[1,16], index: 12, kind: input, shape index: {}]   ;;  %s2692_s13 = inlined_call_operand.hbm [shape: f32[32,16], index: 13, kind: input, shape index: {}]   ;;  %s2693_s14 = inlined_call_operand.vmem [shape: f32[1,16], index: 14, kind: input, shape index: {}]   ;;  %s2694_s15 = inlined_call_operand.vmem [shape: f32[2,32,16], index: 15, kind: output, shape index: {}]  }
   0x1   :  { %21 = vsyncpa [#allocation7], 0 }
   0x2   :  { %22 = vsyncpa [#allocation10], 0  ;;  %s2283_s18 = smov 0  }
   0x3 LB: > { %s2193_s19 = smov [#allocation6]   ;;  %s2289_s21 = sadd.s32 4294967295, %s2191_s18   ;;  %s2191_s18 = sphi %s2283_s18, %s28_s18  }
   0x4   : > { %s405_s20 = sshll.u32 %s2193_s19, 4  ;;  %p1784_p0 = scmp.ge.s32.totalorder %s2191_s18, 1  ;;  %s406_s20 = int_to_ptr.vmem [resolvable:$true] %s405_s20 }
   0x5   : > { %p379_p1 = scmp.lt.s32.totalorder %s2191_s18, 3  ;;  %p2015_p2 = scmp.eq.s32.totalorder %s2289_s21, 0 }
   0x6   : > { %s2194_s23 = smov [#allocation9]   ;;  %s2195_s26 = smov [#allocation4]  }
   0x7   : > { %p2294_p3 = pnand %p1784_p0, %p379_p1  ;;  %s447_s24 = sshll.u32 %s2194_s23, 4  ;;  %s2300_s24 = int_to_ptr.vmem [resolvable:$true] %s447_s24 }
   0x8   : > { %s391_s27 = sshll.u32 %s2195_s26, 4  ;;  %s2196_s28 = smov [#allocation8]   ;;  %s2308_s27 = int_to_ptr.vmem [resolvable:$true] %s391_s27 }
   0x9   : > { %p1999_p4 = pneg %p2294_p3  ;;  %s2310_s29 = sshll.u32 %s2196_s28, 4  ;;  %s423_s29 = int_to_ptr.vmem [resolvable:$true] %s2310_s29 }
   0xa   : > { %s2054_s16 = scalar_lea.vmem %s406_s20, 16  ;;  %s2061_s17 = scalar_lea.vmem %s406_s20, 32 }
   0xb   : > { %p2304_p5 = pnand %p2015_p2, %p1999_p4  ;;  %p2055_p7 = scmp.ne.s32.totalorder %s406_s20, %s2054_s16 }
   0xc   : > { %p2062_p10 = scmp.lt.s32.totalorder %s406_s20, %s406_s20  ;;  %p2063_p11 = scmp.lt.s32.totalorder %s2061_s17, %s2054_s16 }
   0xd   : > { %p2314_p6 = pneg %p2304_p5 }
   0xe   : > { %p2064_p12 = por %p2063_p11, %p2062_p10 }
   0xf   : > { %p2057_p8 = pnand %p2055_p7, %p2314_p6 }
  0x11   : > { %p2058_p9 = pneg %p2057_p8 }
  0x13   : > { %p2065_p13 = pnand %p2064_p12, %p2058_p9 }
  0x15   : > { %2068 = shalt.err (!%p2065_p13)
}
  0x16   : > { %2005 = dma.hbm_to_vmem [thread:$0]  (!%p2304_p5), %s2681_s2, 16, %s406_s20, [#allocation7]  }
  0x17   : > { %s2080_s26 = scalar_lea.vmem %s2300_s24, 512  ;;  %p2088_p7 = scmp.lt.s32.totalorder %s2300_s24, %s2300_s24 }
  0x18   : > { %p2081_p0 = scmp.ne.s32.totalorder %s2300_s24, %s2080_s26  ;;  %p2089_p8 = scmp.lt.s32.totalorder %s2080_s26, %s2080_s26 }
  0x1a   : > { %p2083_p1 = pnand %p2081_p0, %p2314_p6  ;;  %p2090_p9 = por %p2089_p8, %p2088_p7 }
  0x1c   : > { %p2084_p4 = pneg %p2083_p1 }
  0x1e   : > { %p2091_p10 = pnand %p2090_p9, %p2084_p4 }
  0x20   : > { %2094 = shalt.err (!%p2091_p10)
}
  0x21   : > { %s2197_s28 = smov 128   ;;  %s2198_s16 = smov 8  }
  0x22   : > { %2011 = dma.hbm_to_vmem [thread:$0]  (!%p2304_p5), %s2690_s11, 512, %s2300_s24, [#allocation10], %s2197_s28, %s2197_s28, %s2198_s16  }
  0x23   : > { %s2106_s19 = scalar_lea.vmem %s2308_s27, 256  ;;  %p2114_p0 = scmp.lt.s32.totalorder %s2308_s27, %s2308_s27 }
  0x24   : > { %p2107_p11 = scmp.ne.s32.totalorder %s2308_s27, %s2106_s19  ;;  %p2115_p1 = scmp.lt.s32.totalorder %s2106_s19, %s2106_s19 }
  0x26   : > { %p2109_p12 = pnand %p2107_p11, %p2314_p6  ;;  %p2116_p4 = por %p2115_p1, %p2114_p0 }
  0x28   : > { %p2110_p13 = pneg %p2109_p12 }
  0x2a   : > { %p2117_p7 = pnand %p2116_p4, %p2110_p13 }
  0x2c   : > { %2120 = shalt.err (!%p2117_p7)
}
  0x2d   : > { %2002 = dma.hbm_to_vmem [thread:$0]  (!%p2304_p5), %s2680_s1, 256, %s2308_s27, [#allocation5], %s2197_s28, %s2197_s28, %s2198_s16  }
  0x2e   : > { %s2132_s24 = scalar_lea.vmem %s423_s29, 128  ;;  %p2140_p11 = scmp.lt.s32.totalorder %s423_s29, %s423_s29 }
  0x2f   : > { %p2133_p8 = scmp.ne.s32.totalorder %s423_s29, %s2132_s24  ;;  %p2141_p12 = scmp.lt.s32.totalorder %s2132_s24, %s2132_s24 }
  0x31   : > { %p2135_p9 = pnand %p2133_p8, %p2314_p6  ;;  %p2142_p13 = por %p2141_p12, %p2140_p11 }
  0x33   : > { %p2136_p10 = pneg %p2135_p9 }
  0x35   : > { %p2143_p0 = pnand %p2142_p13, %p2136_p10 }
  0x37   : > { %2146 = shalt.err (!%p2143_p0)
}
  0x38   : > { %2008 = dma.hbm_to_vmem [thread:$0]  (!%p2304_p5), %s2684_s5, 128, %s423_s29, [#allocation7]  }
  0x39   : > { %s2199_s19 = smov [#allocation11]  }
  0x3a   : > { %s463_s27 = sshll.u32 %s2199_s19, 4  ;;  %s464_s27 = int_to_ptr.vmem [resolvable:$true] %s463_s27 }
  0x3b   : > { %s2158_s23 = scalar_lea.vmem %s464_s27, 512  ;;  %p2166_p8 = scmp.lt.s32.totalorder %s464_s27, %s464_s27 }
  0x3c   : > { %p2159_p1 = scmp.ne.s32.totalorder %s464_s27, %s2158_s23  ;;  %p2167_p9 = scmp.lt.s32.totalorder %s2158_s23, %s2158_s23 }
  0x3e   : > { %p2161_p4 = pnand %p2159_p1, %p2314_p6  ;;  %p2168_p11 = por %p2167_p9, %p2166_p8 }
  0x40   : > { %p2162_p7 = pneg %p2161_p4 }
  0x42   : > { %p2169_p10 = pnand %p2168_p11, %p2162_p7 }
  0x44   : > { %2172 = shalt.err (!%p2169_p10)
}
  0x45   : > { %2014 = dma.hbm_to_vmem [thread:$0]  (!%p2304_p5), %s2692_s13, 512, %s464_s27, [#allocation10], %s2197_s28, %s2197_s28, %s2198_s16  }
  0x46   : > { %490 = sbr.rel (%p2294_p3) target bundleno = 2101 (0x835), region = 80 }
  0x4b   : > { %2178 = dma.done.wait (%p2015_p2), [#allocation5], 256  }
  0x4c   : > { %2180 = vsyncadd (%p2015_p2), [#allocation5], 4294967040 }
  0x4d   : > { %2182 = dma.done.wait (%p2015_p2), [#allocation7], 144  }
  0x4e   : > { %2184 = vsyncadd (%p2015_p2), [#allocation7], 4294967152 }
  0x4f   : > { %2186 = dma.done.wait (%p2015_p2), [#allocation10], 1024  }
  0x50   : > { %2188 = vsyncadd (%p2015_p2), [#allocation10], 4294966272  ;;  %p554_p3 = scmp.lt.s32.totalorder %s2289_s21, 1  ;;  %vm564_vm0 = vcmask 130048   ;;  %v2200_v0 = vmov 0.0   ;;  %vm571_vm1 = vcmask 64512  }
  0x51   : > { %565 = vst.msk [vmem:[#allocation2] sm:$0xff] %vm564_vm0, %v2200_v0  ;;  %566 = vst.msk [vmem:[#allocation3] sm:$0xff] %vm564_vm0, %v2200_v0  ;;  %v614_v5 = vld [vmem:[#allocation4 + $0x8] sm:$0xff]  ;;  %v613_v6 = vld [vmem:[#allocation4] sm:$0xff]  ;;  %vm585_vm2 = vcmask 1046528   ;;  %s2201_s16 = smov 8  }
  0x52   : > { %s2699_s21 = smov (!%p554_p3, %s2289_s21), 1  ;;  %1891 = vmatprep.subr.mxu0 %v614_v5  ;;  %vm627_vm3 = vcmask 1040384   ;;  %v1801_v38 = vld [vmem:[#allocation6] ss:$0 sm:$0xff]  ;;  %v777_v45 = vld [vmem:[%s2682_s3 + $0x18] sm:$0xff]  ;;  %v897_v49 = vld [vmem:[#allocation8] sm:$0xff] }
  0x53   : > { %s1838_s22 = sshll.u32 %s2699_s21, 5  ;;  %1892 = vmatpush3.msra.mxu0 %v614_v5  ;;  %1901 = vmatprep.subr.mxu1 %v777_v45  ;;  %v776_v50 = vld [vmem:[%s2682_s3 + $0x10] sm:$0xff]  ;;  %v775_v53 = vld [vmem:[%s2682_s3 + $0x8] sm:$0xff]  ;;  %v774_v55 = vld [vmem:[%s2682_s3] sm:$0xff]  ;;  %s2202_s25 = smov 16   ;;  %vm799_vm4 = vcmask 261120  }
  0x54   : > { %s558_s28 = scalar_lea.vmem %s2679_s0, %s1838_s22  ;;  %1893 = vmatprep.subr.mxu0 %v613_v6  ;;  %1902 = vmatpush3.msra.mxu1 %v777_v45  ;;  %vm1019_vm5 = vcmask 1045504   ;;  %vm1063_vm6 = vcmask 1041408   ;;  %vm1353_vm7 = vcmask 1043456   ;;  %s563_s27 = scalar_lea.vmem %s2694_s15, %s1838_s22 }
  0x55   : > { %v567_v1 = vld [vmem:[%s558_s28] sm:$0xff]  ;;  %v568_v2 = vld [vmem:[%s558_s28 + $0x8] sm:$0xff]  ;;  %v569_v3 = vld [vmem:[%s558_s28 + $0x10] sm:$0xff]  ;;  %1894 = vmatpush3.msra.mxu0 %v613_v6  ;;  %1903 = vmatprep.subr.mxu1 %v776_v50 }
  0x56   : > { %572 = vst.msk [vmem:[#allocation2 + $0x8] sm:$0xff] %vm571_vm1, %v567_v1  ;;  %573 = vst.msk [vmem:[#allocation2 + $0x10] sm:$0xff] %vm571_vm1, %v568_v2  ;;  %v570_v4 = vld [vmem:[%s558_s28 + $0x18] sm:$0xff]  ;;  %1915 = vmatprep.subr.mxu0 %v897_v49  ;;  %1904 = vmatpush3.msra.mxu1 %v776_v50 }
  0x57   : > { %574 = vst.msk [vmem:[#allocation2 + $0x18] sm:$0xff] %vm571_vm1, %v569_v3  ;;  %575 = vst.msk [vmem:[#allocation2 + $0x20] sm:$0xff] %vm571_vm1, %v570_v4  ;;  %1905 = vmatprep.subr.mxu1 %v775_v53 }
  0x58   : > { %v2415_v19 = vld [vmem:[#allocation2] sm:$0xff]  ;;  %1906 = vmatpush3.msra.mxu1 %v775_v53  ;;  %v2465_v3 = vld [vmem:[#allocation3] sm:$0xff] }
  0x59   : > { %1907 = vmatprep.subr.mxu1 %v774_v55  ;;  %v1048_v53 = vld [vmem:[%s2686_s7 + $0x8] sm:$0xff] }
  0x5a   : > { %1908 = vmatpush3.msra.mxu1 %v774_v55 }
  0x5d   : > { %v577_v7 = vld [vmem:[#allocation2 + $0x8] sm:$0xff]  ;;  %v2403_v8 = vld [vmem:[#allocation2 + $0x10] sm:$0xff] }
  0x5e   : > { %v2405_v9 = vld [vmem:[#allocation2 + $0x18] sm:$0xff]  ;;  %v586_v10 = vrot.slane %v577_v7, 1  ;;  %v587_v11 = vrot.slane %v2403_v8, 1  ;;  %v2409_v13 = vld [vmem:[#allocation2 + $0x20] sm:$0xff] }
  0x5f   : > { %v589_v12 = vrot.slane %v2405_v9, 1  ;;  %v591_v14 = vrot.slane %v2409_v13, 1 }
  0x60   : > { %593 = vrot.lane.b32.xlu0 %v586_v10, %s2201_s16  ;;  %v588_v16 = vsel %vm585_vm2, %v586_v10, %v587_v11 }
  0x61   : > { %v590_v15 = vsel %vm585_vm2, %v587_v11, %v589_v12  ;;  %v592_v17 = vsel %vm585_vm2, %v589_v12, %v591_v14 }
  0x62   : > { %597 = vrot.lane.b32.xlu1 %v590_v15, %s2201_s16 }
  0x64   : > { %595 = vrot.lane.b32.xlu0 %v588_v16, %s2201_s16 }
  0x66   : > { %599 = vrot.lane.b32.xlu1 %v592_v17, %s2201_s16 }
  0x68   : > { %601 = vrot.lane.b32.xlu0 %v591_v14, %s2201_s16 }
  0xd2   : > { %v594_v18 = vpop.permute.xlu0 %593 }
  0xd3   : > { %v608_v22 = vsel %vm571_vm1, %v2415_v19, %v594_v18 }
  0xd4   : > { %v598_v20 = vpop.permute.xlu1 %597  ;;  %v628_v27 = vrot.slane %v608_v22, 7 }
  0xd5   : > { %v610_v21 = vsel %vm571_vm1, %v2403_v8, %v598_v20 }
  0xd6   : > { %v631_v23 = vrot.slane %v610_v21, 7  ;;  %v596_v24 = vpop.permute.xlu0 %595 }
  0xd7   : > { %v609_v25 = vsel %vm571_vm1, %v577_v7, %v596_v24 }
  0xd8   : > { %v600_v26 = vpop.permute.xlu1 %599  ;;  %v629_v28 = vrot.slane %v609_v25, 7  ;;  %v1806_v25 = vld [vmem:[%s2683_s4] ss:$0 sm:$0xff] }
  0xd9   : > { %v611_v29 = vsel %vm571_vm1, %v2405_v9, %v600_v26  ;;  %v1811_v26 = vld [vmem:[%s2685_s6] ss:$0 sm:$0xff] }
  0xda   : > { %v633_v30 = vrot.slane %v611_v29, 7  ;;  %v602_v31 = vpop.permute.xlu0 %601  ;;  %v630_v32 = vsel %vm627_vm3, %v628_v27, %v629_v28  ;;  %v632_v33 = vsel %vm627_vm3, %v629_v28, %v631_v23 }
  0xdb   : > { %v612_v34 = vsel %vm571_vm1, %v2409_v13, %v602_v31  ;;  %1895 = vmatprep.mubr.msk.f32.mxu0 %vm564_vm0, %v630_v32 }
  0xdc   : > { %v634_v35 = vsel %vm627_vm3, %v631_v23, %v633_v30  ;;  %v635_v36 = vrot.slane %v612_v34, 7  ;;  %1896 = vmatmul.mubr.msk.f32.vlgmr.msra.gmra.mxu0 %vm564_vm0, %v632_v33 }
  0xdd   : > { %1898 = vmatprep.mubr.msk.f32.mxu0 %vm564_vm0, %v634_v35  ;;  %1916 = vmatpush3.msra.mxu0 %v897_v49 }
  0xde   : > { %v636_v37 = vsel %vm627_vm3, %v633_v30, %v635_v36 }
  0xe0   : > { %1899 = vmatmul.mubr.msk.f32.gmra.mxu0 %vm564_vm0, %v636_v37 }
  0xe1   : > { %1917 = vmatprep.mubr.msk.f32.mxu0 %vm571_vm1, %v577_v7 }
  0xe4   : > { %1918 = vmatmul.mubr.msk.f32.vlgmr.msra.gmra.mxu0 %vm571_vm1, %v2403_v8 }
  0xe5   : > { %1920 = vmatprep.mubr.msk.f32.mxu0 %vm571_vm1, %v2405_v9 }
  0xe8   : > { %1921 = vmatmul.mubr.msk.f32.gmra.mxu0 %vm571_vm1, %v2409_v13 }
 0x19c   : > { %v1897_v39 = vpop.f32.mrf.mxu0 }
 0x19d   : > { %v717_v40 = vadd.f32 %v1897_v39, %v1801_v38 }
 0x19e   : > { %v711_v41 = vpop.f32.mrf.mxu0 }
 0x19f   : > { %v731_v42 = vmax.f32 %v717_v40, 0.0  ;;  %v712_v43 = vadd.f32 %v1801_v38, %v711_v41 }
 0x1a0   : > { %v1900_v44 = vpop.f32.mrf.mxu0 }
 0x1a1   : > { %735 = vst.msk [vmem:[#allocation3 + $0x10] sm:$0xff] %vm564_vm0, %v731_v42  ;;  %v730_v46 = vmax.f32 %v712_v43, 0.0  ;;  %v727_v47 = vadd.f32 %v1900_v44, %v1801_v38 }
 0x1a2   : > { %v721_v48 = vpop.f32.mrf.mxu0 }
 0x1a3   : > { %734 = vst.msk [vmem:[#allocation3 + $0x8] sm:$0xff] %vm564_vm0, %v730_v46  ;;  %v733_v51 = vmax.f32 %v727_v47, 0.0  ;;  %v722_v52 = vadd.f32 %v1801_v38, %v721_v48  ;;  %v1050_v47 = vld [vmem:[%s2686_s7 + $0x18] sm:$0xff] }
 0x1a4   : > { %v1919_v24 = vpop.f32.mrf.mxu0  ;;  %1923 = vmatprep.subr.mxu1 %v1050_v47 }
 0x1a5   : > { %737 = vst.msk [vmem:[#allocation3 + $0x20] sm:$0xff] %vm564_vm0, %v733_v51  ;;  %v732_v54 = vmax.f32 %v722_v52, 0.0  ;;  %v985_v30 = vadd.f32 %v1919_v24, %v1811_v26  ;;  %v1049_v52 = vld [vmem:[%s2686_s7 + $0x10] sm:$0xff] }
 0x1a6   : > { %v979_v27 = vpop.f32.mrf.mxu0 }
 0x1a7   : > { %736 = vst.msk [vmem:[#allocation3 + $0x18] sm:$0xff] %vm564_vm0, %v732_v54  ;;  %v980_v35 = vadd.f32 %v1811_v26, %v979_v27 }
 0x1a8   : > { %v740_v56 = vld [vmem:[#allocation3 + $0x10] sm:$0xff]  ;;  %v1922_v32 = vpop.f32.mrf.mxu0 }
 0x1a9   : > { %v748_v59 = vrot.slane %v740_v56, 1  ;;  %v995_v40 = vadd.f32 %v1922_v32, %v1811_v26 }
 0x1aa   : > { %v739_v57 = vld [vmem:[#allocation3 + $0x8] sm:$0xff]  ;;  %v989_v42 = vpop.f32.mrf.mxu0 }
 0x1ab   : > { %v747_v58 = vrot.slane %v739_v57, 1  ;;  %v990_v51 = vadd.f32 %v1811_v26, %v989_v42  ;;  %v1816_v26 = vld [vmem:[%s2687_s8] ss:$0 sm:$0xff] }
 0x1ac   : > { %v742_v60 = vld [vmem:[#allocation3 + $0x20] sm:$0xff]  ;;  %v1210_v42 = vld [vmem:[%s2688_s9] sm:$0xff] }
 0x1ad   : > { %754 = vrot.lane.b32.xlu1 %v747_v58, %s2202_s25  ;;  %v749_v61 = vsel %vm585_vm2, %v747_v58, %v748_v59  ;;  %v752_v0 = vrot.slane %v742_v60, 1 }
 0x1ae   : > { %756 = vrot.lane.b32.xlu0 %v749_v61, %s2202_s25  ;;  %v741_v62 = vld [vmem:[#allocation3 + $0x18] sm:$0xff] }
 0x1af   : > { %v750_v63 = vrot.slane %v741_v62, 1 }
 0x1b1   : > { %v751_v1 = vsel %vm585_vm2, %v748_v59, %v750_v63  ;;  %v753_v2 = vsel %vm585_vm2, %v750_v63, %v752_v0 }
 0x1b2   : > { %758 = vrot.lane.b32.xlu1 %v751_v1, %s2202_s25  ;;  %760 = vrot.lane.b32.xlu0 %v753_v2, %s2202_s25 }
 0x1b6   : > { %762 = vrot.lane.b32.xlu1 %v752_v0, %s2202_s25 }
 0x21f   : > { %v755_v4 = vpop.permute.xlu1 %754 }
 0x220   : > { %v769_v5 = vsel %vm564_vm0, %v2465_v3, %v755_v4  ;;  %v757_v6 = vpop.permute.xlu0 %756 }
 0x221   : > { %v790_v7 = vrot.slane %v769_v5, 7  ;;  %v770_v8 = vsel %vm564_vm0, %v739_v57, %v757_v6  ;;  %v1047_v57 = vld [vmem:[%s2686_s7] sm:$0xff] }
 0x222   : > { %v791_v9 = vrot.slane %v770_v8, 7 }
 0x224   : > { %v759_v10 = vpop.permute.xlu1 %758  ;;  %v761_v11 = vpop.permute.xlu0 %760  ;;  %v792_v12 = vsel %vm627_vm3, %v790_v7, %v791_v9 }
 0x225   : > { %v771_v13 = vsel %vm564_vm0, %v740_v56, %v759_v10  ;;  %v772_v14 = vsel %vm564_vm0, %v741_v62, %v761_v11  ;;  %1909 = vmatprep.mubr.msk.f32.mxu1 %vm799_vm4, %v792_v12 }
 0x226   : > { %v793_v15 = vrot.slane %v771_v13, 7  ;;  %v795_v16 = vrot.slane %v772_v14, 7 }
 0x228   : > { %v763_v17 = vpop.permute.xlu1 %762  ;;  %v794_v18 = vsel %vm627_vm3, %v791_v9, %v793_v15  ;;  %v796_v20 = vsel %vm627_vm3, %v793_v15, %v795_v16 }
 0x229   : > { %v773_v21 = vsel %vm564_vm0, %v742_v60, %v763_v17  ;;  %1910 = vmatmul.mubr.msk.f32.vlgmr.msra.gmra.mxu1 %vm799_vm4, %v794_v18 }
 0x22a   : > { %v797_v22 = vrot.slane %v773_v21, 7  ;;  %1912 = vmatprep.mubr.msk.f32.mxu1 %vm799_vm4, %v796_v20  ;;  %1924 = vmatpush3.msra.mxu1 %v1050_v47 }
 0x22b   : > { %1925 = vmatprep.subr.mxu1 %v1049_v52 }
 0x22c   : > { %v798_v23 = vsel %vm627_vm3, %v795_v16, %v797_v22  ;;  %1926 = vmatpush3.msra.mxu1 %v1049_v52 }
 0x22d   : > { %1913 = vmatmul.mubr.msk.f32.gmra.mxu1 %vm799_vm4, %v798_v23  ;;  %1927 = vmatprep.subr.mxu1 %v1048_v53 }
 0x22e   : > { %1928 = vmatpush3.msra.mxu1 %v1048_v53 }
 0x22f   : > { %1929 = vmatprep.subr.mxu1 %v1047_v57 }
 0x230   : > { %1930 = vmatpush3.msra.mxu1 %v1047_v57 }
 0x2e9   : > { %v1911_v28 = vpop.f32.mrf.mxu1 }
 0x2ea   : > { %v880_v29 = vadd.f32 %v1911_v28, %v1806_v25 }
 0x2eb   : > { %v874_v31 = vpop.f32.mrf.mxu1 }
 0x2ec   : > { %v894_v33 = vmax.f32 %v880_v29, 0.0  ;;  %v875_v34 = vadd.f32 %v1806_v25, %v874_v31 }
 0x2ed   : > { %v1914_v36 = vpop.f32.mrf.mxu1 }
 0x2ee   : > { %v999_v37 = vadd.f32 %v985_v30, %v894_v33  ;;  %v893_v38 = vmax.f32 %v875_v34, 0.0  ;;  %v890_v39 = vadd.f32 %v1914_v36, %v1806_v25  ;;  %v1213_v33 = vld [vmem:[%s2688_s9 + $0x18] sm:$0xff] }
 0x2ef   : > { %v884_v41 = vpop.f32.mrf.mxu1  ;;  %1937 = vmatprep.subr.mxu0 %v1213_v33 }
 0x2f0   : > { %v1003_v43 = vmax.f32 %v999_v37, 0.0  ;;  %v998_v44 = vadd.f32 %v980_v35, %v893_v38  ;;  %v896_v45 = vmax.f32 %v890_v39, 0.0  ;;  %v885_v46 = vadd.f32 %v1806_v25, %v884_v41  ;;  %1938 = vmatpush3.msra.mxu0 %v1213_v33  ;;  %v1212_v37 = vld [vmem:[%s2688_s9 + $0x10] sm:$0xff]  ;;  %v1211_v38 = vld [vmem:[%s2688_s9 + $0x8] sm:$0xff] }
 0x2f1   : > { %1939 = vmatprep.subr.mxu0 %v1212_v37 }
 0x2f2   : > { %1007 = vst.msk [vmem:[#allocation2 + $0x10] sm:$0xff] %vm564_vm0, %v1003_v43  ;;  %v1002_v48 = vmax.f32 %v998_v44, 0.0  ;;  %v1001_v49 = vadd.f32 %v995_v40, %v896_v45  ;;  %v895_v50 = vmax.f32 %v885_v46, 0.0  ;;  %1940 = vmatpush3.msra.mxu0 %v1212_v37  ;;  %v1381_v37 = vld [vmem:[#allocation9] sm:$0xff] }
 0x2f3   : > { %1941 = vmatprep.subr.mxu0 %v1211_v38 }
 0x2f4   : > { %1006 = vst.msk [vmem:[#allocation2 + $0x8] sm:$0xff] %vm564_vm0, %v1002_v48  ;;  %v1005_v54 = vmax.f32 %v1001_v49, 0.0  ;;  %v1000_v55 = vadd.f32 %v990_v51, %v895_v50  ;;  %1942 = vmatpush3.msra.mxu0 %v1211_v38 }
 0x2f5   : > { %1943 = vmatprep.subr.mxu0 %v1210_v42 }
 0x2f6   : > { %1009 = vst.msk [vmem:[#allocation2 + $0x20] sm:$0xff] %vm564_vm0, %v1005_v54  ;;  %v1004_v56 = vmax.f32 %v1000_v55, 0.0  ;;  %1944 = vmatpush3.msra.mxu0 %v1210_v42 }
 0x2f8   : > { %1008 = vst.msk [vmem:[#allocation2 + $0x18] sm:$0xff] %vm564_vm0, %v1004_v56 }
 0x2f9   : > { %v2503_v58 = vld [vmem:[#allocation2 + $0x10] sm:$0xff] }
 0x2fa   : > { %v1021_v61 = vrot.slane %v2503_v58, 2 }
 0x2fb   : > { %v2505_v59 = vld [vmem:[#allocation2 + $0x8] sm:$0xff] }
 0x2fc   : > { %v1020_v60 = vrot.slane %v2505_v59, 2 }
 0x2fd   : > { %v2509_v62 = vld [vmem:[#allocation2 + $0x20] sm:$0xff] }
 0x2fe   : > { %1027 = vrot.lane.b32.xlu0 %v1020_v60, %s2202_s25  ;;  %v1022_v63 = vsel %vm1019_vm5, %v1020_v60, %v1021_v61  ;;  %v1025_v2 = vrot.slane %v2509_v62, 2 }
 0x2ff   : > { %1029 = vrot.lane.b32.xlu1 %v1022_v63, %s2202_s25  ;;  %v2514_v0 = vld [vmem:[#allocation2 + $0x18] sm:$0xff] }
 0x300   : > { %v1023_v1 = vrot.slane %v2514_v0, 2 }
 0x302   : > { %v1026_v4 = vsel %vm1019_vm5, %v1023_v1, %v1025_v2  ;;  %v1024_v5 = vsel %vm1019_vm5, %v1021_v61, %v1023_v1 }
 0x303   : > { %1033 = vrot.lane.b32.xlu1 %v1026_v4, %s2202_s25  ;;  %1031 = vrot.lane.b32.xlu0 %v1024_v5, %s2202_s25 }
 0x307   : > { %1035 = vrot.lane.b32.xlu0 %v1025_v2, %s2202_s25 }
 0x370   : > { %v1028_v6 = vpop.permute.xlu0 %1027 }
 0x371   : > { %v1042_v7 = vsel %vm564_vm0, %v2415_v19, %v1028_v6  ;;  %v1030_v8 = vpop.permute.xlu1 %1029 }
 0x372   : > { %v1064_v9 = vrot.slane %v1042_v7, 6  ;;  %v1043_v10 = vsel %vm564_vm0, %v2505_v59, %v1030_v8 }
 0x373   : > { %v1065_v11 = vrot.slane %v1043_v10, 6 }
 0x375   : > { %v1034_v12 = vpop.permute.xlu1 %1033  ;;  %v1032_v13 = vpop.permute.xlu0 %1031  ;;  %v1066_v14 = vsel %vm1063_vm6, %v1064_v9, %v1065_v11 }
 0x376   : > { %v1045_v15 = vsel %vm564_vm0, %v2514_v0, %v1034_v12  ;;  %v1044_v16 = vsel %vm564_vm0, %v2503_v58, %v1032_v13  ;;  %1931 = vmatprep.mubr.msk.f32.mxu1 %vm799_vm4, %v1066_v14  ;;  %v1821_v14 = vld [vmem:[%s2689_s10] ss:$0 sm:$0xff] }
 0x377   : > { %v1069_v17 = vrot.slane %v1045_v15, 6  ;;  %v1067_v18 = vrot.slane %v1044_v16, 6 }
 0x379   : > { %v1068_v20 = vsel %vm1063_vm6, %v1065_v11, %v1067_v18  ;;  %v1036_v21 = vpop.permute.xlu0 %1035  ;;  %v1070_v22 = vsel %vm1063_vm6, %v1067_v18, %v1069_v17 }
 0x37a   : > { %v1046_v23 = vsel %vm564_vm0, %v2509_v62, %v1036_v21  ;;  %1932 = vmatmul.mubr.msk.f32.vlgmr.msra.gmra.mxu1 %vm799_vm4, %v1068_v20 }
 0x37b   : > { %v1071_v24 = vrot.slane %v1046_v23, 6  ;;  %1934 = vmatprep.mubr.msk.f32.mxu1 %vm799_vm4, %v1070_v22 }
 0x37d   : > { %v1072_v25 = vsel %vm1063_vm6, %v1069_v17, %v1071_v24 }
 0x37e   : > { %1935 = vmatmul.mubr.msk.f32.gmra.mxu1 %vm799_vm4, %v1072_v25 }
 0x43a   : > { %v1933_v27 = vpop.f32.mrf.mxu1 }
 0x43b   : > { %v1153_v28 = vadd.f32 %v1933_v27, %v1816_v26 }
 0x43c   : > { %v1147_v29 = vpop.f32.mrf.mxu1 }
 0x43d   : > { %v1167_v30 = vmax.f32 %v1153_v28, 0.0  ;;  %v1148_v31 = vadd.f32 %v1816_v26, %v1147_v29 }
 0x43e   : > { %v1936_v32 = vpop.f32.mrf.mxu1 }
 0x43f   : > { %1171 = vst.msk [vmem:[#allocation3 + $0x10] sm:$0xff] %vm564_vm0, %v1167_v30  ;;  %v1166_v34 = vmax.f32 %v1148_v31, 0.0  ;;  %v1163_v35 = vadd.f32 %v1936_v32, %v1816_v26  ;;  %v1384_v30 = vld [vmem:[#allocation9 + $0x18] sm:$0xff] }
 0x440   : > { %v1157_v36 = vpop.f32.mrf.mxu1  ;;  %1951 = vmatprep.subr.mxu1 %v1384_v30 }
 0x441   : > { %1170 = vst.msk [vmem:[#allocation3 + $0x8] sm:$0xff] %vm564_vm0, %v1166_v34  ;;  %v1169_v39 = vmax.f32 %v1163_v35, 0.0  ;;  %v1158_v40 = vadd.f32 %v1816_v26, %v1157_v36  ;;  %1952 = vmatpush3.msra.mxu1 %v1384_v30  ;;  %v1383_v34 = vld [vmem:[#allocation9 + $0x10] sm:$0xff]  ;;  %v1382_v35 = vld [vmem:[#allocation9 + $0x8] sm:$0xff] }
 0x442   : > { %1953 = vmatprep.subr.mxu1 %v1383_v34 }
 0x443   : > { %1173 = vst.msk [vmem:[#allocation3 + $0x20] sm:$0xff] %vm564_vm0, %v1169_v39  ;;  %v1168_v41 = vmax.f32 %v1158_v40, 0.0  ;;  %1954 = vmatpush3.msra.mxu1 %v1383_v34 }
 0x444   : > { %1955 = vmatprep.subr.mxu1 %v1382_v35 }
 0x445   : > { %1172 = vst.msk [vmem:[#allocation3 + $0x18] sm:$0xff] %vm564_vm0, %v1168_v41  ;;  %1956 = vmatpush3.msra.mxu1 %v1382_v35 }
 0x446   : > { %v1176_v43 = vld [vmem:[#allocation3 + $0x10] sm:$0xff]  ;;  %1957 = vmatprep.subr.mxu1 %v1381_v37 }
 0x447   : > { %v1184_v46 = vrot.slane %v1176_v43, 2  ;;  %1958 = vmatpush3.msra.mxu1 %v1381_v37 }
 0x448   : > { %v1175_v44 = vld [vmem:[#allocation3 + $0x8] sm:$0xff] }
 0x449   : > { %v1183_v45 = vrot.slane %v1175_v44, 2 }
 0x44a   : > { %v1178_v47 = vld [vmem:[#allocation3 + $0x20] sm:$0xff] }
 0x44b   : > { %1190 = vrot.lane.b32.xlu1 %v1183_v45, %s2202_s25  ;;  %v1185_v48 = vsel %vm1019_vm5, %v1183_v45, %v1184_v46  ;;  %v1188_v51 = vrot.slane %v1178_v47, 2 }
 0x44c   : > { %1192 = vrot.lane.b32.xlu0 %v1185_v48, %s2202_s25  ;;  %v1177_v49 = vld [vmem:[#allocation3 + $0x18] sm:$0xff] }
 0x44d   : > { %v1186_v50 = vrot.slane %v1177_v49, 2 }
 0x44f   : > { %v1189_v52 = vsel %vm1019_vm5, %v1186_v50, %v1188_v51  ;;  %v1187_v53 = vsel %vm1019_vm5, %v1184_v46, %v1186_v50 }
 0x450   : > { %1196 = vrot.lane.b32.xlu0 %v1189_v52, %s2202_s25  ;;  %1194 = vrot.lane.b32.xlu1 %v1187_v53, %s2202_s25 }
 0x454   : > { %1198 = vrot.lane.b32.xlu1 %v1188_v51, %s2202_s25 }
 0x4bd   : > { %v1191_v54 = vpop.permute.xlu1 %1190 }
 0x4be   : > { %v1205_v55 = vsel %vm564_vm0, %v2465_v3, %v1191_v54  ;;  %v1193_v56 = vpop.permute.xlu0 %1192 }
 0x4bf   : > { %v1226_v57 = vrot.slane %v1205_v55, 6  ;;  %v1206_v60 = vsel %vm564_vm0, %v1175_v44, %v1193_v56 }
 0x4c0   : > { %v1227_v61 = vrot.slane %v1206_v60, 6 }
 0x4c2   : > { %v1195_v63 = vpop.permute.xlu1 %1194  ;;  %v1197_v1 = vpop.permute.xlu0 %1196  ;;  %v1228_v2 = vsel %vm1063_vm6, %v1226_v57, %v1227_v61 }
 0x4c3   : > { %v1207_v4 = vsel %vm564_vm0, %v1176_v43, %v1195_v63  ;;  %v1208_v5 = vsel %vm564_vm0, %v1177_v49, %v1197_v1  ;;  %1945 = vmatprep.mubr.msk.f32.mxu0 %vm799_vm4, %v1228_v2 }
 0x4c4   : > { %v1229_v6 = vrot.slane %v1207_v4, 6  ;;  %v1231_v7 = vrot.slane %v1208_v5, 6 }
 0x4c6   : > { %v1230_v8 = vsel %vm1063_vm6, %v1227_v61, %v1229_v6  ;;  %v1199_v9 = vpop.permute.xlu1 %1198  ;;  %v1232_v10 = vsel %vm1063_vm6, %v1229_v6, %v1231_v7  ;;  %v1826_v6 = vld [vmem:[%s2691_s12] ss:$0 sm:$0xff] }
 0x4c7   : > { %v1209_v11 = vsel %vm564_vm0, %v1178_v47, %v1199_v9  ;;  %1946 = vmatmul.mubr.msk.f32.vlgmr.msra.gmra.mxu0 %vm799_vm4, %v1230_v8 }
 0x4c8   : > { %v1233_v12 = vrot.slane %v1209_v11, 6  ;;  %1948 = vmatprep.mubr.msk.f32.mxu0 %vm799_vm4, %v1232_v10 }
 0x4ca   : > { %v1234_v13 = vsel %vm1063_vm6, %v1231_v7, %v1233_v12 }
 0x4cb   : > { %1949 = vmatmul.mubr.msk.f32.gmra.mxu0 %vm799_vm4, %v1234_v13  ;;  %v1546_v13 = vld [vmem:[#allocation11 + $0x18] sm:$0xff] }
 0x4cc   : > { %1965 = vmatprep.subr.mxu0 %v1546_v13 }
 0x4cd   : > { %1966 = vmatpush3.msra.mxu0 %v1546_v13 }
 0x587   : > { %v1947_v15 = vpop.f32.mrf.mxu0 }
 0x588   : > { %v1315_v16 = vadd.f32 %v1947_v15, %v1821_v14 }
 0x589   : > { %v1309_v17 = vpop.f32.mrf.mxu0 }
 0x58a   : > { %v1329_v18 = vmax.f32 %v1315_v16, 0.0  ;;  %v1310_v20 = vadd.f32 %v1821_v14, %v1309_v17  ;;  %v1545_v17 = vld [vmem:[#allocation11 + $0x10] sm:$0xff] }
 0x58b   : > { %v1950_v21 = vpop.f32.mrf.mxu0  ;;  %1967 = vmatprep.subr.mxu0 %v1545_v17 }
 0x58c   : > { %v1333_v22 = vadd.f32 %v1329_v18, %v2503_v58  ;;  %v1328_v23 = vmax.f32 %v1310_v20, 0.0  ;;  %v1325_v24 = vadd.f32 %v1950_v21, %v1821_v14  ;;  %v1544_v18 = vld [vmem:[#allocation11 + $0x8] sm:$0xff]  ;;  %1968 = vmatpush3.msra.mxu0 %v1545_v17 }
 0x58d   : > { %v1319_v25 = vpop.f32.mrf.mxu0  ;;  %1969 = vmatprep.subr.mxu0 %v1544_v18 }
 0x58e   : > { %v1337_v26 = vmax.f32 %v1333_v22, 0.0  ;;  %v1332_v27 = vadd.f32 %v1328_v23, %v2505_v59  ;;  %v1331_v28 = vmax.f32 %v1325_v24, 0.0  ;;  %v1320_v29 = vadd.f32 %v1821_v14, %v1319_v25  ;;  %1970 = vmatpush3.msra.mxu0 %v1544_v18  ;;  %v1543_v23 = vld [vmem:[#allocation11] sm:$0xff] }
 0x58f   : > { %1971 = vmatprep.subr.mxu0 %v1543_v23 }
 0x590   : > { %1341 = vst.msk [vmem:[#allocation2 + $0x10] sm:$0xff] %vm564_vm0, %v1337_v26  ;;  %v1336_v31 = vmax.f32 %v1332_v27, 0.0  ;;  %v1335_v32 = vadd.f32 %v1331_v28, %v2509_v62  ;;  %v1330_v33 = vmax.f32 %v1320_v29, 0.0  ;;  %1972 = vmatpush3.msra.mxu0 %v1543_v23 }
 0x592   : > { %1340 = vst.msk [vmem:[#allocation2 + $0x8] sm:$0xff] %vm564_vm0, %v1336_v31  ;;  %v1339_v58 = vmax.f32 %v1335_v32, 0.0  ;;  %v1334_v36 = vadd.f32 %v1330_v33, %v2514_v0 }
 0x594   : > { %1343 = vst.msk [vmem:[#allocation2 + $0x20] sm:$0xff] %vm564_vm0, %v1339_v58  ;;  %v1338_v59 = vmax.f32 %v1334_v36, 0.0 }
 0x596   : > { %1342 = vst.msk [vmem:[#allocation2 + $0x18] sm:$0xff] %vm564_vm0, %v1338_v59 }
 0x597   : > { %v2593_v62 = vld [vmem:[#allocation2 + $0x10] sm:$0xff] }
 0x598   : > { %v1355_v0 = vrot.slane %v2593_v62, 4 }
 0x599   : > { %v2595_v38 = vld [vmem:[#allocation2 + $0x8] sm:$0xff] }
 0x59a   : > { %v1354_v39 = vrot.slane %v2595_v38, 4 }
 0x59b   : > { %v2599_v40 = vld [vmem:[#allocation2 + $0x20] sm:$0xff] }
 0x59c   : > { %1361 = vrot.lane.b32.xlu0 %v1354_v39, %s2202_s25  ;;  %v1356_v41 = vsel %vm1353_vm7, %v1354_v39, %v1355_v0  ;;  %v1359_v44 = vrot.slane %v2599_v40, 4 }
 0x59d   : > { %1363 = vrot.lane.b32.xlu1 %v1356_v41, %s2202_s25  ;;  %v2604_v42 = vld [vmem:[#allocation2 + $0x18] sm:$0xff] }
 0x59e   : > { %v1357_v43 = vrot.slane %v2604_v42, 4 }
 0x5a0   : > { %v1360_v45 = vsel %vm1353_vm7, %v1357_v43, %v1359_v44  ;;  %v1358_v46 = vsel %vm1353_vm7, %v1355_v0, %v1357_v43 }
 0x5a1   : > { %1367 = vrot.lane.b32.xlu1 %v1360_v45, %s2202_s25  ;;  %1365 = vrot.lane.b32.xlu0 %v1358_v46, %s2202_s25 }
 0x5a5   : > { %1369 = vrot.lane.b32.xlu0 %v1359_v44, %s2202_s25 }
 0x60e   : > { %v1362_v47 = vpop.permute.xlu0 %1361 }
 0x60f   : > { %v1376_v48 = vsel %vm564_vm0, %v2415_v19, %v1362_v47  ;;  %v1364_v49 = vpop.permute.xlu1 %1363 }
 0x610   : > { %v1397_v50 = vrot.slane %v1376_v48, 4  ;;  %v1377_v51 = vsel %vm564_vm0, %v2595_v38, %v1364_v49 }
 0x611   : > { %v1398_v52 = vrot.slane %v1377_v51, 4 }
 0x613   : > { %v1368_v53 = vpop.permute.xlu1 %1367  ;;  %v1366_v54 = vpop.permute.xlu0 %1365  ;;  %v1399_v55 = vsel %vm1353_vm7, %v1397_v50, %v1398_v52 }
 0x614   : > { %v1379_v56 = vsel %vm564_vm0, %v2604_v42, %v1368_v53  ;;  %v1378_v57 = vsel %vm564_vm0, %v2593_v62, %v1366_v54  ;;  %1959 = vmatprep.mubr.msk.f32.mxu1 %vm799_vm4, %v1399_v55  ;;  %v1831_v53 = vld [vmem:[%s2693_s14] ss:$0 sm:$0xff] }
 0x615   : > { %v1402_v60 = vrot.slane %v1379_v56, 4  ;;  %v1400_v19 = vrot.slane %v1378_v57, 4 }
 0x617   : > { %v1401_v61 = vsel %vm1353_vm7, %v1398_v52, %v1400_v19  ;;  %v1370_v63 = vpop.permute.xlu0 %1369  ;;  %v1403_v1 = vsel %vm1353_vm7, %v1400_v19, %v1402_v60 }
 0x618   : > { %v1380_v2 = vsel %vm564_vm0, %v2599_v40, %v1370_v63  ;;  %1960 = vmatmul.mubr.msk.f32.vlgmr.msra.gmra.mxu1 %vm799_vm4, %v1401_v61 }
 0x619   : > { %v1404_v4 = vrot.slane %v1380_v2, 4  ;;  %1962 = vmatprep.mubr.msk.f32.mxu1 %vm799_vm4, %v1403_v1 }
 0x61b   : > { %v1405_v5 = vsel %vm1353_vm7, %v1402_v60, %v1404_v4 }
 0x61c   : > { %1963 = vmatmul.mubr.msk.f32.gmra.mxu1 %vm799_vm4, %v1405_v5 }
 0x6d8   : > { %v1961_v7 = vpop.f32.mrf.mxu1 }
 0x6d9   : > { %v1486_v8 = vadd.f32 %v1961_v7, %v1826_v6 }
 0x6da   : > { %v1480_v9 = vpop.f32.mrf.mxu1 }
 0x6db   : > { %v1500_v10 = vmax.f32 %v1486_v8, 0.0  ;;  %v1481_v11 = vadd.f32 %v1826_v6, %v1480_v9 }
 0x6dc   : > { %v1964_v12 = vpop.f32.mrf.mxu1 }
 0x6dd   : > { %1504 = vst.msk [vmem:[#allocation3 + $0x10] sm:$0xff] %vm564_vm0, %v1500_v10  ;;  %v1499_v14 = vmax.f32 %v1481_v11, 0.0  ;;  %v1496_v15 = vadd.f32 %v1964_v12, %v1826_v6 }
 0x6de   : > { %v1490_v16 = vpop.f32.mrf.mxu1 }
 0x6df   : > { %1503 = vst.msk [vmem:[#allocation3 + $0x8] sm:$0xff] %vm564_vm0, %v1499_v14  ;;  %v1502_v20 = vmax.f32 %v1496_v15, 0.0  ;;  %v1491_v21 = vadd.f32 %v1826_v6, %v1490_v16 }
 0x6e1   : > { %1506 = vst.msk [vmem:[#allocation3 + $0x20] sm:$0xff] %vm564_vm0, %v1502_v20  ;;  %v1501_v22 = vmax.f32 %v1491_v21, 0.0 }
 0x6e3   : > { %1505 = vst.msk [vmem:[#allocation3 + $0x18] sm:$0xff] %vm564_vm0, %v1501_v22 }
 0x6e4   : > { %v1509_v24 = vld [vmem:[#allocation3 + $0x10] sm:$0xff] }
 0x6e5   : > { %v1517_v27 = vrot.slane %v1509_v24, 4 }
 0x6e6   : > { %v1508_v25 = vld [vmem:[#allocation3 + $0x8] sm:$0xff] }
 0x6e7   : > { %v1516_v26 = vrot.slane %v1508_v25, 4 }
 0x6e8   : > { %v1511_v28 = vld [vmem:[#allocation3 + $0x20] sm:$0xff] }
 0x6e9   : > { %1523 = vrot.lane.b32.xlu1 %v1516_v26, %s2202_s25  ;;  %v1518_v29 = vsel %vm1353_vm7, %v1516_v26, %v1517_v27  ;;  %v1521_v32 = vrot.slane %v1511_v28, 4 }
 0x6ea   : > { %1525 = vrot.lane.b32.xlu0 %v1518_v29, %s2202_s25  ;;  %v1510_v30 = vld [vmem:[#allocation3 + $0x18] sm:$0xff] }
 0x6eb   : > { %v1519_v31 = vrot.slane %v1510_v30, 4 }
 0x6ed   : > { %v1522_v33 = vsel %vm1353_vm7, %v1519_v31, %v1521_v32  ;;  %v1520_v34 = vsel %vm1353_vm7, %v1517_v27, %v1519_v31 }
 0x6ee   : > { %1529 = vrot.lane.b32.xlu0 %v1522_v33, %s2202_s25  ;;  %1527 = vrot.lane.b32.xlu1 %v1520_v34, %s2202_s25 }
 0x6f2   : > { %1531 = vrot.lane.b32.xlu1 %v1521_v32, %s2202_s25 }
 0x75b   : > { %v1524_v35 = vpop.permute.xlu1 %1523 }
 0x75c   : > { %v1538_v58 = vsel %vm564_vm0, %v2465_v3, %v1524_v35  ;;  %v1526_v36 = vpop.permute.xlu0 %1525 }
 0x75d   : > { %v1559_v59 = vrot.slane %v1538_v58, 4  ;;  %v1539_v37 = vsel %vm564_vm0, %v1508_v25, %v1526_v36 }
 0x75e   : > { %v1560_v39 = vrot.slane %v1539_v37, 4 }
 0x760   : > { %v1528_v0 = vpop.permute.xlu1 %1527  ;;  %v1530_v41 = vpop.permute.xlu0 %1529  ;;  %v1561_v43 = vsel %vm1353_vm7, %v1559_v59, %v1560_v39 }
 0x761   : > { %v1540_v44 = vsel %vm564_vm0, %v1509_v24, %v1528_v0  ;;  %v1541_v45 = vsel %vm564_vm0, %v1510_v30, %v1530_v41  ;;  %1973 = vmatprep.mubr.msk.f32.mxu0 %vm799_vm4, %v1561_v43 }
 0x762   : > { %v1562_v46 = vrot.slane %v1540_v44, 4  ;;  %v1564_v47 = vrot.slane %v1541_v45, 4 }
 0x764   : > { %v1563_v48 = vsel %vm1353_vm7, %v1560_v39, %v1562_v46  ;;  %v1532_v3 = vpop.permute.xlu1 %1531  ;;  %v1565_v49 = vsel %vm1353_vm7, %v1562_v46, %v1564_v47 }
 0x765   : > { %v1542_v50 = vsel %vm564_vm0, %v1511_v28, %v1532_v3  ;;  %1974 = vmatmul.mubr.msk.f32.vlgmr.msra.gmra.mxu0 %vm799_vm4, %v1563_v48 }
 0x766   : > { %v1566_v51 = vrot.slane %v1542_v50, 4  ;;  %1976 = vmatprep.mubr.msk.f32.mxu0 %vm799_vm4, %v1565_v49 }
 0x768   : > { %v1567_v52 = vsel %vm1353_vm7, %v1564_v47, %v1566_v51 }
 0x769   : > { %1977 = vmatmul.mubr.msk.f32.gmra.mxu0 %vm799_vm4, %v1567_v52 }
 0x825   : > { %v1975_v54 = vpop.f32.mrf.mxu0 }
 0x826   : > { %v1648_v55 = vadd.f32 %v1975_v54, %v1831_v53 }
 0x827   : > { %v1642_v56 = vpop.f32.mrf.mxu0 }
 0x828   : > { %v1662_v57 = vmax.f32 %v1648_v55, 0.0  ;;  %v1643_v60 = vadd.f32 %v1831_v53, %v1642_v56 }
 0x829   : > { %v1978_v19 = vpop.f32.mrf.mxu0 }
 0x82a   : > { %v1666_v61 = vadd.f32 %v1662_v57, %v2593_v62  ;;  %v1661_v63 = vmax.f32 %v1643_v60, 0.0  ;;  %v1658_v1 = vadd.f32 %v1978_v19, %v1831_v53 }
 0x82b   : > { %v1652_v2 = vpop.f32.mrf.mxu0 }
 0x82c   : > { %v1670_v4 = vmax.f32 %v1666_v61, 0.0  ;;  %v1665_v5 = vadd.f32 %v1661_v63, %v2595_v38  ;;  %v1664_v6 = vmax.f32 %v1658_v1, 0.0  ;;  %v1653_v7 = vadd.f32 %v1831_v53, %v1652_v2 }
 0x82e   : > { %1674 = vst.msk [vmem:[%s563_s27 + $0x8] sm:$0xff] %vm564_vm0, %v1670_v4  ;;  %v1669_v8 = vmax.f32 %v1665_v5, 0.0  ;;  %v1668_v9 = vadd.f32 %v1664_v6, %v2599_v40  ;;  %v1663_v10 = vmax.f32 %v1653_v7, 0.0 }
 0x830   : > { %1673 = vst.msk [vmem:[%s563_s27] sm:$0xff] %vm564_vm0, %v1669_v8  ;;  %v1672_v62 = vmax.f32 %v1668_v9, 0.0  ;;  %v1667_v11 = vadd.f32 %v1663_v10, %v2604_v42 }
 0x832   : > { %1676 = vst.msk [vmem:[%s563_s27 + $0x18] sm:$0xff] %vm564_vm0, %v1672_v62  ;;  %v1671_v12 = vmax.f32 %v1667_v11, 0.0 }
 0x834   : > { %1675 = vst.msk [vmem:[%s563_s27 + $0x10] sm:$0xff] %vm564_vm0, %v1671_v12 }
 0x835 PF: > { %s28_s18 = sadd.s32 1, %s2191_s18  }
 0x836   : > { %p25_p2 = scmp.ge.s32.totalorder %s28_s18, 4  }
 0x838   :  { %27 = sbr.rel (!%p25_p2) target bundleno = 3 (0x3), region = 131 }
 0x83d   :  { %1698 = vsyncpa [#allocation5], 1 }
 0x83e   :  { %1700 = vsyncpa [#allocation5 + $0x1], 1 }
 0x83f   :  { %1701 = vsyncpa [#allocation7], 1 }
 0x840   :  { %1702 = vsyncpa [#allocation10], 1 }

</bundles_post_ra>
